<compile_context>
chip_gen: v7x
topology: tpu7x:2x2x1
jax: 0.10.0
libtpu: 0.0.40
codegen_flags: <defaults>
</compile_context>

<pallas_src>
import jax
import jax.numpy as jnp
from jax.experimental import pallas as pl
from jax.experimental.pallas import tpu as pltpu

LN_EPS = 1e-5


def _round_up(n, m):
    return ((n + m - 1) // m) * m


def _make_swiglu_kernel(hp, h_true, compute_dtype):
    """Kernel with static padded/true hidden dims baked in as Python literals."""
    inv_h = float(1.0 / h_true)  # Python float -> jaxpr literal (no captured tracer)

    def kernel(x_ref, w12_ref, b12_ref, ln_ref, w3_ref, b3_ref, o_ref):
        # Cast activations to the MXU dtype inside the kernel (f32 stays f32
        # only if compute_dtype is f32).
        x = x_ref[...].astype(compute_dtype)                      # [tm, Ep]

        # Fused gate/up projection: one MXU pass of width 2*Hp, f32 accumulate.
        x12 = jnp.dot(x, w12_ref[...],
                      preferred_element_type=jnp.float32) + b12_ref[...]
        x1 = x12[:, :hp]          # lane-aligned (Hp % 128 == 0) -> free slices
        x2 = x12[:, hp:]

        # SiLU(x1) * x2 in f32 (sigmoid -> EUP slot). Padded lanes are exactly 0.
        h = (x1 * jax.nn.sigmoid(x1)) * x2                        # f32 [tm, Hp]

        # LayerNorm over the TRUE hidden dim. Padded lanes of h are zero
        # (zero-padded weight columns & biases) so no masking is needed.
        mean = jnp.sum(h, axis=-1, keepdims=True) * inv_h
        var = jnp.maximum(
            jnp.sum(h * h, axis=-1, keepdims=True) * inv_h - mean * mean, 0.0)
        gamma = ln_ref[0:1, :]
        beta = ln_ref[1:2, :]
        hn = (h - mean) * jax.lax.rsqrt(var + LN_EPS) * gamma + beta

        # w3(hn): bf16 MXU operands, f32 accumulation.
        out = jnp.dot(hn.astype(compute_dtype), w3_ref[...],
                      preferred_element_type=jnp.float32) + b3_ref[...]
        o_ref[...] = out.astype(o_ref.dtype)

    return kernel


def prepare_swiglu_params(w1, b1, w2, b2, gamma, beta, w3, b3,
                          *, compute_dtype=jnp.bfloat16, lane_multiple=128):
    """One-time param prep: transpose to [in,out], pad, fuse w1|w2, cast.

    PyTorch layouts: w1, w2: [H, E]; w3: [E, H]; biases/gamma/beta: 1-D.
    Do this ONCE and reuse the result. For large dims on v6e/v7x (2x256^2 MXU)
    pass lane_multiple=256 to fill the systolic array width.
    """
    H, E = w1.shape
    Ep, Hp = _round_up(E, lane_multiple), _round_up(H, lane_multiple)

    w1t = jnp.pad(w1.T, ((0, Ep - E), (0, Hp - H)))
    w2t = jnp.pad(w2.T, ((0, Ep - E), (0, Hp - H)))
    w12t = jnp.concatenate([w1t, w2t], axis=1).astype(compute_dtype)   # [Ep, 2*Hp]
    w3t = jnp.pad(w3.T, ((0, Hp - H), (0, Ep - E))).astype(compute_dtype)

    f32 = jnp.float32
    b12 = jnp.concatenate([jnp.pad(b1, (0, Hp - H)),
                           jnp.pad(b2, (0, Hp - H))]).astype(f32).reshape(1, 2 * Hp)
    ln = jnp.stack([jnp.pad(gamma, (0, Hp - H)),
                    jnp.pad(beta, (0, Hp - H))]).astype(f32)            # [2, Hp]
    b3p = jnp.pad(b3, (0, Ep - E)).astype(f32).reshape(1, Ep)

    return dict(E=E, H=H, Ep=Ep, Hp=Hp,
                w12t=w12t, w3t=w3t, b12=b12, ln=ln, b3=b3p)


def _const_spec(shape):
    """Grid-invariant (resident) input: single-buffered in VMEM."""
    try:
        return pl.BlockSpec(shape, lambda i: (0, 0), pipeline_mode=pl.Buffered(1))
    except TypeError:  # older jax without pipeline_mode kwarg
        return pl.BlockSpec(shape, lambda i: (0, 0))


def swiglu_pallas(x, params, *, tm=256):
    """x: [T, E] (tokens, embed); params from prepare_swiglu_params()."""
    T, E = x.shape
    assert E == params["E"], "embed_dim mismatch"
    H, Ep, Hp = params["H"], params["Ep"], params["Hp"]
    compute_dtype = params["w12t"].dtype
    out_dtype = x.dtype

    # Balanced token tiles: ~equal tiles, multiple of 8 sublanes, capped at tm.
    # Ensure >=2 grid steps when there is enough work so v7x's two TensorCores
    # both get a share (dimension_semantics "parallel").
    n_tiles = pl.cdiv(T, tm)
    if T >= 256:
        n_tiles = max(n_tiles, 2)
    n_tiles = max(n_tiles, 1)
    tm_eff = _round_up(pl.cdiv(T, n_tiles), 8)
    Tp = _round_up(T, tm_eff)
    grid = (Tp // tm_eff,)

    # Pad only when needed; no wrapper-side dtype cast (cast happens in-kernel).
    xp = x
    if (Tp, Ep) != (T, E):
        xp = jnp.pad(x, ((0, Tp - T), (0, Ep - E)))

    kernel = _make_swiglu_kernel(Hp, H, compute_dtype)

    # ---- VMEM budget ----------------------------------------------------
    w_itm = jnp.dtype(compute_dtype).itemsize
    weight_bytes = (Ep * 2 * Hp + Hp * Ep) * w_itm          # single-buffered
    small_bytes = (2 * Hp + 2 * Hp + Ep) * 4                # biases / LN params
    io_bytes = 2 * tm_eff * Ep * (jnp.dtype(x.dtype).itemsize
                                  + jnp.dtype(out_dtype).itemsize)
    inter_bytes = 6 * tm_eff * Hp * 4                       # x12, h, hn, temps (f32)
    vmem_needed = weight_bytes + small_bytes + io_bytes + inter_bytes + (4 << 20)

    # Per-generation ceiling: physical per-core VMEM minus headroom for Mosaic
    # internal scratch (v5e/v6e: 128 MiB -> ~112 MiB; v7x: 64 MiB -> ~48 MiB).
    try:
        vmem_cap = int(pltpu.get_tpu_info().vmem_capacity_bytes)
    except Exception:
        vmem_cap = 64 << 20                                  # safe on every gen
    vmem_ceiling = max(32 << 20, vmem_cap - (16 << 20))
    vmem_limit = int(min(max(vmem_needed, 32 << 20), vmem_ceiling))

    out = pl.pallas_call(
        kernel,
        out_shape=jax.ShapeDtypeStruct((Tp, Ep), out_dtype),
        grid=grid,
        in_specs=[
            pl.BlockSpec((tm_eff, Ep), lambda i: (i, 0)),    # x tile (streamed)
            _const_spec((Ep, 2 * Hp)),                       # w1|w2 fused
            _const_spec((1, 2 * Hp)),                        # b1|b2 fused
            _const_spec((2, Hp)),                            # LN gamma/beta
            _const_spec((Hp, Ep)),                           # w3^T
            _const_spec((1, Ep)),                            # b3
        ],
        out_specs=pl.BlockSpec((tm_eff, Ep), lambda i: (i, 0)),
        compiler_params=pltpu.CompilerParams(
            dimension_semantics=("parallel",),
            vmem_limit_bytes=vmem_limit,
        ),
    )(xp, params["w12t"], params["b12"], params["ln"], params["w3t"],
      params["b3"])

    if (Tp, Ep) != (T, E):
        out = out[:T, :E]
    return out


def swiglu_ref(x, w1, b1, w2, b2, gamma, beta, w3, b3):
    x = x.astype(jnp.float32)
    x1 = x @ w1.T + b1
    x2 = x @ w2.T + b2
    h = jax.nn.silu(x1) * x2
    mean = jnp.mean(h, axis=-1, keepdims=True)
    var = jnp.var(h, axis=-1, keepdims=True)
    hn = (h - mean) / jnp.sqrt(var + LN_EPS) * gamma + beta
    return hn @ w3.T + b3


if __name__ == "__main__":
    batch, seq = 2, 8
    embed_dim, hidden_dim = 32, 64

    key = jax.random.PRNGKey(0)
    ks = jax.random.split(key, 8)

    # Deterministic synthetic parameters (PyTorch nn.Linear layouts).
    x = jax.random.normal(ks[0], (batch, seq, embed_dim), jnp.float32)
    w1 = jax.random.normal(ks[1], (hidden_dim, embed_dim), jnp.float32) * 0.05
    b1 = jax.random.normal(ks[2], (hidden_dim,), jnp.float32) * 0.05
    w2 = jax.random.normal(ks[3], (hidden_dim, embed_dim), jnp.float32) * 0.05
    b2 = jax.random.normal(ks[4], (hidden_dim,), jnp.float32) * 0.05
    w3 = jax.random.normal(ks[5], (embed_dim, hidden_dim), jnp.float32) * 0.05
    b3 = jax.random.normal(ks[6], (embed_dim,), jnp.float32) * 0.05
    gamma = jnp.ones((hidden_dim,), jnp.float32)   # LayerNorm weight
    beta = jnp.zeros((hidden_dim,), jnp.float32)   # LayerNorm bias

    # One-time parameter prep (transpose / pad / fuse / bf16 cast).
    params = prepare_swiglu_params(w1, b1, w2, b2, gamma, beta, w3, b3)

    x2d = x.reshape(batch * seq, embed_dim)        # layout: [tokens, embed]

    out = swiglu_pallas(x2d, params)
    out = jax.block_until_ready(out)

    ref = swiglu_ref(x2d, w1, b1, w2, b2, gamma, beta, w3, b3)
    assert out.shape == (batch * seq, embed_dim)
    # bf16 MXU operands with f32 accumulation -> slightly looser tolerance
    # than the pure-f32 reference.
    assert jnp.allclose(out, ref, atol=5e-2, rtol=5e-2), "mismatch vs reference"

    # reshape back to [batch, seq, embed] for the caller
    _ = out.reshape(batch, seq, embed_dim)
    print("KERNEL_OK")
</pallas_src>

<mosaic_0001>
module attributes {stable_mosaic.version = 11 : i64} {
  func.func @kernel(%arg0: i32, %arg1: memref<16x128xf32, #tpu.memory_space<vmem>>, %arg2: memref<128x256xbf16, #tpu.memory_space<vmem>>, %arg3: memref<1x256xf32, #tpu.memory_space<vmem>>, %arg4: memref<2x128xf32, #tpu.memory_space<vmem>>, %arg5: memref<128x128xbf16, #tpu.memory_space<vmem>>, %arg6: memref<1x128xf32, #tpu.memory_space<vmem>>, %arg7: memref<16x128xf32, #tpu.memory_space<vmem>>) attributes {dimension_semantics = [#tpu.dimension_semantics<parallel>], iteration_bounds = array<i64: 1>, scalar_prefetch = 0 : i64, scratch_operands = 0 : i64, tpu.core_type = #tpu.core_type<tc>, window_params = [{transform_indices = @transform_0, window_bounds = array<i64: 16, 128>}, {pipeline_mode = #tpu.pipeline_mode<synchronous>, transform_indices = @transform_1, window_bounds = array<i64: 128, 256>}, {pipeline_mode = #tpu.pipeline_mode<synchronous>, transform_indices = @transform_2, window_bounds = array<i64: 1, 256>}, {pipeline_mode = #tpu.pipeline_mode<synchronous>, transform_indices = @transform_3, window_bounds = array<i64: 2, 128>}, {pipeline_mode = #tpu.pipeline_mode<synchronous>, transform_indices = @transform_4, window_bounds = array<i64: 128, 128>}, {pipeline_mode = #tpu.pipeline_mode<synchronous>, transform_indices = @transform_5, window_bounds = array<i64: 1, 128>}, {transform_indices = @transform_6, window_bounds = array<i64: 16, 128>}]} {
    %c0 = arith.constant 0 : index
    %c0_0 = arith.constant 0 : index
    %0 = vector.load %arg1[%c0, %c0_0] : memref<16x128xf32, #tpu.memory_space<vmem>>, vector<16x128xf32>
    %1 = arith.truncf %0 : vector<16x128xf32> to vector<16x128xbf16>
    %c0_1 = arith.constant 0 : index
    %c0_2 = arith.constant 0 : index
    %2 = vector.load %arg2[%c0_1, %c0_2] : memref<128x256xbf16, #tpu.memory_space<vmem>>, vector<128x256xbf16>
    %cst = arith.constant dense<0.000000e+00> : vector<16x256xf32>
    %3 = tpu.matmul %1, %2, %cst {dimension_numbers = #tpu.dot_dimension_numbers<[1], [0], [0], [1], [0, 0, 1, 1], [], []>} : vector<16x128xbf16>, vector<128x256xbf16>, vector<16x256xf32> -> vector<16x256xf32>
    %c0_3 = arith.constant 0 : index
    %c0_4 = arith.constant 0 : index
    %4 = vector.load %arg3[%c0_3, %c0_4] : memref<1x256xf32, #tpu.memory_space<vmem>>, vector<1x256xf32>
    %5 = vector.broadcast %4 : vector<1x256xf32> to vector<16x256xf32>
    %6 = arith.addf %3, %5 : vector<16x256xf32>
    %7 = vector.extract_strided_slice %6 {offsets = [0, 0], sizes = [16, 128], strides = [1, 1]} : vector<16x256xf32> to vector<16x128xf32>
    %8 = vector.extract_strided_slice %6 {offsets = [0, 128], sizes = [16, 128], strides = [1, 1]} : vector<16x256xf32> to vector<16x128xf32>
    %9 = arith.negf %7 : vector<16x128xf32>
    %10 = math.exp %9 : vector<16x128xf32>
    %cst_5 = arith.constant 1.000000e+00 : f32
    %11 = vector.broadcast %cst_5 : f32 to vector<16x128xf32>
    %12 = arith.addf %11, %10 : vector<16x128xf32>
    %13 = arith.divf %11, %12 : vector<16x128xf32>
    %14 = arith.mulf %7, %13 : vector<16x128xf32>
    %15 = arith.mulf %14, %8 : vector<16x128xf32>
    %cst_6 = arith.constant dense<0.000000e+00> : vector<16xf32>
    %16 = vector.multi_reduction <add>, %15, %cst_6 [1] : vector<16x128xf32> to vector<16xf32>
    %17 = vector.shape_cast %16 : vector<16xf32> to vector<16x1xf32>
    %cst_7 = arith.constant 1.562500e-02 : f32
    %18 = vector.broadcast %cst_7 : f32 to vector<16x1xf32>
    %19 = arith.mulf %17, %18 : vector<16x1xf32>
    %20 = arith.mulf %15, %15 : vector<16x128xf32>
    %cst_8 = arith.constant dense<0.000000e+00> : vector<16xf32>
    %21 = vector.multi_reduction <add>, %20, %cst_8 [1] : vector<16x128xf32> to vector<16xf32>
    %22 = vector.shape_cast %21 : vector<16xf32> to vector<16x1xf32>
    %cst_9 = arith.constant 1.562500e-02 : f32
    %23 = vector.broadcast %cst_9 : f32 to vector<16x1xf32>
    %24 = arith.mulf %22, %23 : vector<16x1xf32>
    %25 = arith.mulf %19, %19 : vector<16x1xf32>
    %26 = arith.subf %24, %25 : vector<16x1xf32>
    %cst_10 = arith.constant 0.000000e+00 : f32
    %27 = vector.broadcast %cst_10 : f32 to vector<16x1xf32>
    %28 = arith.maximumf %26, %27 : vector<16x1xf32>
    %c0_11 = arith.constant 0 : index
    %c0_12 = arith.constant 0 : index
    %29 = vector.load %arg4[%c0_11, %c0_12] : memref<2x128xf32, #tpu.memory_space<vmem>>, vector<1x128xf32>
    %c1 = arith.constant 1 : index
    %c0_13 = arith.constant 0 : index
    %30 = vector.load %arg4[%c1, %c0_13] : memref<2x128xf32, #tpu.memory_space<vmem>>, vector<1x128xf32>
    %31 = vector.broadcast %19 : vector<16x1xf32> to vector<16x128xf32>
    %32 = arith.subf %15, %31 : vector<16x128xf32>
    %cst_14 = arith.constant 9.99999974E-6 : f32
    %33 = vector.broadcast %cst_14 : f32 to vector<16x1xf32>
    %34 = arith.addf %28, %33 : vector<16x1xf32>
    %35 = math.rsqrt %34 : vector<16x1xf32>
    %36 = vector.broadcast %35 : vector<16x1xf32> to vector<16x128xf32>
    %37 = arith.mulf %32, %36 : vector<16x128xf32>
    %38 = vector.broadcast %29 : vector<1x128xf32> to vector<16x128xf32>
    %39 = arith.mulf %37, %38 : vector<16x128xf32>
    %40 = vector.broadcast %30 : vector<1x128xf32> to vector<16x128xf32>
    %41 = arith.addf %39, %40 : vector<16x128xf32>
    %42 = arith.truncf %41 : vector<16x128xf32> to vector<16x128xbf16>
    %c0_15 = arith.constant 0 : index
    %c0_16 = arith.constant 0 : index
    %43 = vector.load %arg5[%c0_15, %c0_16] : memref<128x128xbf16, #tpu.memory_space<vmem>>, vector<128x128xbf16>
    %cst_17 = arith.constant dense<0.000000e+00> : vector<16x128xf32>
    %44 = tpu.matmul %42, %43, %cst_17 {dimension_numbers = #tpu.dot_dimension_numbers<[1], [0], [0], [1], [0, 0, 1, 1], [], []>} : vector<16x128xbf16>, vector<128x128xbf16>, vector<16x128xf32> -> vector<16x128xf32>
    %c0_18 = arith.constant 0 : index
    %c0_19 = arith.constant 0 : index
    %45 = vector.load %arg6[%c0_18, %c0_19] : memref<1x128xf32, #tpu.memory_space<vmem>>, vector<1x128xf32>
    %46 = vector.broadcast %45 : vector<1x128xf32> to vector<16x128xf32>
    %47 = arith.addf %44, %46 : vector<16x128xf32>
    %c0_20 = arith.constant 0 : index
    %c0_21 = arith.constant 0 : index
    %48 = vector.load %arg7[%c0_20, %c0_21] : memref<16x128xf32, #tpu.memory_space<vmem>>, vector<16x128xf32>
    tpu.vector_store %arg7[%c0_20, %c0_21], %47 {strides = array<i32>} : memref<16x128xf32, #tpu.memory_space<vmem>>, vector<16x128xf32>,
    return
  }
  func.func @transform_0(%arg0: i32) -> (i32, i32) {
    %c0_i32 = arith.constant 0 : i32
    %c0_i32_0 = arith.constant 0 : i32
    return %arg0, %c0_i32 : i32, i32
  }
  func.func @transform_1(%arg0: i32) -> (i32, i32) {
    %c0_i32 = arith.constant 0 : i32
    %c0_i32_0 = arith.constant 0 : i32
    %c0_i32_1 = arith.constant 0 : i32
    return %c0_i32, %c0_i32_0 : i32, i32
  }
  func.func @transform_2(%arg0: i32) -> (i32, i32) {
    %c0_i32 = arith.constant 0 : i32
    %c0_i32_0 = arith.constant 0 : i32
    %c0_i32_1 = arith.constant 0 : i32
    return %c0_i32, %c0_i32_0 : i32, i32
  }
  func.func @transform_3(%arg0: i32) -> (i32, i32) {
    %c0_i32 = arith.constant 0 : i32
    %c0_i32_0 = arith.constant 0 : i32
    %c0_i32_1 = arith.constant 0 : i32
    return %c0_i32, %c0_i32_0 : i32, i32
  }
  func.func @transform_4(%arg0: i32) -> (i32, i32) {
    %c0_i32 = arith.constant 0 : i32
    %c0_i32_0 = arith.constant 0 : i32
    %c0_i32_1 = arith.constant 0 : i32
    return %c0_i32, %c0_i32_0 : i32, i32
  }
  func.func @transform_5(%arg0: i32) -> (i32, i32) {
    %c0_i32 = arith.constant 0 : i32
    %c0_i32_0 = arith.constant 0 : i32
    %c0_i32_1 = arith.constant 0 : i32
    return %c0_i32, %c0_i32_0 : i32, i32
  }
  func.func @transform_6(%arg0: i32) -> (i32, i32) {
    %c0_i32 = arith.constant 0 : i32
    %c0_i32_0 = arith.constant 0 : i32
    return %arg0, %c0_i32 : i32, i32
  }
}

</mosaic_0001>

<bundles_post_ra>
// kernel: tpu_custom_call.1
= control target key start
LH: loop header
LB: loop body
LE: loop exit
PB: predicated region body
PF: predicated region fallthrough
CT: control target
= control target key end

     0   :  { %11 = vsyncpa [#allocation3], 0  ;;  %s740_s0 = inlined_call_operand.hbm [shape: f32[16,128], index: 0, kind: input, shape index: {}]   ;;  %s741_s1 = inlined_call_operand.hbm [shape: bf16[128,256], index: 1, kind: input, shape index: {}]   ;;  %s742_s2 = inlined_call_operand.vmem [shape: f32[1,256], index: 2, kind: input, shape index: {}]   ;;  %s743_s3 = inlined_call_operand.vmem [shape: f32[2,128], index: 3, kind: input, shape index: {}]   ;;  %s744_s4 = inlined_call_operand.hbm [shape: bf16[128,128], index: 4, kind: input, shape index: {}]   ;;  %s745_s5 = inlined_call_operand.vmem [shape: f32[1,128], index: 5, kind: input, shape index: {}]   ;;  %s746_s6 = inlined_call_operand.hbm [shape: f32[16,128], index: 6, kind: output, shape index: {}]  }
   0x1   :  { %12 = vsyncpa [#allocation6], 0 }
   0x2   :  { %13 = vsyncpa [#allocation4], 0  ;;  %s618_s21 = smov [#allocation5]   ;;  %s619_s23 = smov [#allocation2]  }
   0x3   :  { %s31_s22 = sshll.u32 %s618_s21, 4  ;;  %s19_s24 = sshll.u32 %s619_s23, 4  ;;  %s32_s22 = int_to_ptr.vmem [resolvable:$true] %s31_s22  ;;  %s664_s24 = int_to_ptr.vmem [resolvable:$true] %s19_s24 }
   0x4   :  { %s524_s27 = scalar_lea.hbm %s741_s1, 2048 }
   0x5   :  { %p525_p0 = scmp.ne.s32.totalorder %s741_s1, %s524_s27  ;;  %p528_p1 = scmp.lt.u32.totalorder %s524_s27, %s741_s1 }
   0x7   :  { %p530_p2 = pnand %p528_p1, %p525_p0 }
   0x9   :  { %533 = shalt.err (!%p530_p2)
}
   0xa   :  { %s534_s8 = scalar_lea.vmem %s32_s22, 2048  ;;  %p539_p4 = scmp.lt.s32.totalorder %s32_s22, %s32_s22 }
   0xb   :  { %p535_p3 = scmp.ne.s32.totalorder %s32_s22, %s534_s8  ;;  %p540_p5 = scmp.lt.s32.totalorder %s534_s8, %s534_s8 }
   0xd   :  { %p541_p6 = por %p540_p5, %p539_p4 }
   0xf   :  { %p542_p7 = pnand %p541_p6, %p535_p3 }
  0x11   :  { %545 = shalt.err (!%p542_p7)
}
  0x12   :  { %s620_s9 = smov 128   ;;  %s621_s10 = smov 8  }
  0x13   :  { %37 = dma.hbm_to_vmem [thread:$0]  %s741_s1, 2048, %s32_s22, [#allocation6], %s620_s9, %s620_s9, %s621_s10  }
  0x14   :  { %s546_s15 = scalar_lea.hbm %s740_s0, 256 }
  0x15   :  { %p547_p8 = scmp.ne.s32.totalorder %s740_s0, %s546_s15  ;;  %p550_p9 = scmp.lt.u32.totalorder %s546_s15, %s740_s0 }
  0x17   :  { %p552_p10 = pnand %p550_p9, %p547_p8 }
  0x19   :  { %555 = shalt.err (!%p552_p10)
}
  0x1a   :  { %s556_s20 = scalar_lea.vmem %s664_s24, 256  ;;  %p561_p12 = scmp.lt.s32.totalorder %s664_s24, %s664_s24 }
  0x1b   :  { %p557_p11 = scmp.ne.s32.totalorder %s664_s24, %s556_s20  ;;  %p562_p13 = scmp.lt.s32.totalorder %s556_s20, %s556_s20 }
  0x1d   :  { %p563_p0 = por %p562_p13, %p561_p12 }
  0x1f   :  { %p564_p1 = pnand %p563_p0, %p557_p11 }
  0x21   :  { %567 = shalt.err (!%p564_p1)
}
  0x22   :  { %25 = dma.hbm_to_vmem [thread:$0]  %s740_s0, 256, %s664_s24, [#allocation3], %s620_s9, %s620_s9, %s621_s10  }
  0x23   :  { %s622_s22 = smov [#allocation7]   ;;  %s568_s27 = scalar_lea.hbm %s744_s4, 1024 }
  0x24   :  { %s47_s23 = sshll.u32 %s622_s22, 4  ;;  %p569_p2 = scmp.ne.s32.totalorder %s744_s4, %s568_s27  ;;  %s48_s23 = int_to_ptr.vmem [resolvable:$true] %s47_s23 }
  0x25   :  { %p572_p3 = scmp.lt.u32.totalorder %s568_s27, %s744_s4 }
  0x27   :  { %p574_p4 = pnand %p572_p3, %p569_p2 }
  0x29   :  { %577 = shalt.err (!%p574_p4)
}
  0x2a   :  { %s578_s8 = scalar_lea.vmem %s48_s23, 1024  ;;  %p583_p6 = scmp.lt.s32.totalorder %s48_s23, %s48_s23 }
  0x2b   :  { %p579_p5 = scmp.ne.s32.totalorder %s48_s23, %s578_s8  ;;  %p584_p7 = scmp.lt.s32.totalorder %s578_s8, %s578_s8 }
  0x2d   :  { %p585_p8 = por %p584_p7, %p583_p6 }
  0x2f   :  { %p586_p9 = pnand %p585_p8, %p579_p5 }
  0x31   :  { %589 = shalt.err (!%p586_p9)
}
  0x32   :  { %s623_s0 = smov 64   ;;  %s624_s24 = smov 4  }
  0x33   :  { %53 = dma.hbm_to_vmem [thread:$0]  %s744_s4, 1024, %s48_s23, [#allocation6], %s623_s0, %s623_s0, %s624_s24  }
  0x34   :  { %612 = dma.done.wait [#allocation3], 256  }
  0x35   :  { %613 = vsyncadd [#allocation3], 4294967040 }
  0x36   :  { %614 = dma.done.wait [#allocation6], 3072  }
  0x37   :  { %615 = vsyncadd [#allocation6], 4294964224  ;;  %v625_v0 = vmov 0   ;;  %v480_v1 = vld [vmem:[#allocation5 + $0x4] ss:$8 sps:$4 sm:$0xff]   ;;  %v66_v17 = vld [vmem:[#allocation2] sm:$0xff]  ;;  %v87_v20 = vlaneseq }
  0x38   :  { %209 = vmatprep.mubr.bf16.mxu0 %v625_v0  ;;  %v482_v2 = vld [vmem:[#allocation5] ss:$8 sps:$4 sm:$0xff]   ;;  %177 = vmatprep.subr.bf16.mxu0 %v480_v1  ;;  %v483_v3 = vld [vmem:[#allocation5 + $0x14] ss:$8 sps:$4 sm:$0xff]   ;;  %v485_v4 = vld [vmem:[#allocation5 + $0x10] ss:$8 sps:$4 sm:$0xff]  }
  0x39   :  { %178 = vmatpush1.bf16.msra.mxu0 %v482_v2  ;;  %v486_v5 = vld [vmem:[#allocation5 + $0x24] ss:$8 sps:$4 sm:$0xff]   ;;  %v488_v6 = vld [vmem:[#allocation5 + $0x20] ss:$8 sps:$4 sm:$0xff]   ;;  %v489_v7 = vld [vmem:[#allocation5 + $0x34] ss:$8 sps:$4 sm:$0xff]  }
  0x3a   :  { %179 = vmatprep.subr.bf16.mxu0 %v483_v3  ;;  %v491_v8 = vld [vmem:[#allocation5 + $0x30] ss:$8 sps:$4 sm:$0xff]   ;;  %v492_v9 = vld [vmem:[#allocation5 + $0x44] ss:$8 sps:$4 sm:$0xff]   ;;  %v494_v10 = vld [vmem:[#allocation5 + $0x40] ss:$8 sps:$4 sm:$0xff]  }
  0x3b   :  { %v495_v11 = vld [vmem:[#allocation5 + $0x54] ss:$8 sps:$4 sm:$0xff]   ;;  %v497_v12 = vld [vmem:[#allocation5 + $0x50] ss:$8 sps:$4 sm:$0xff]   ;;  %v498_v13 = vld [vmem:[#allocation5 + $0x64] ss:$8 sps:$4 sm:$0xff]  }
  0x3c   :  { %v500_v14 = vld [vmem:[#allocation5 + $0x60] ss:$8 sps:$4 sm:$0xff]   ;;  %v501_v15 = vld [vmem:[#allocation5 + $0x74] ss:$8 sps:$4 sm:$0xff]   ;;  %v503_v16 = vld [vmem:[#allocation5 + $0x70] ss:$8 sps:$4 sm:$0xff]  }
  0x3d   :  { %180 = vmatpush1.bf16.msra.mxu0 %v485_v4  ;;  %v67_v18 = vld [vmem:[#allocation2 + $0x8] sm:$0xff]  ;;  %v88_v21 = vshrl.u32 %v87_v20, 7  ;;  %v85_v23 = vld [vmem:[%s742_s2] sm:$0x3]  ;;  %v504_v49 = vld [vmem:[#allocation7] sm:$0xff]   ;;  %v626_v50 = vmov 0.0  }
  0x3e   :  { %181 = vmatprep.subr.bf16.mxu0 %v486_v5  ;;  %v68_v19 = vpack.c.bf16 %v67_v18, %v66_v17  ;;  %449 = vmatprep.subr.bf16.mxu1 %v626_v50  ;;  %v505_v51 = vld [vmem:[#allocation7 + $0x8] sm:$0xff]   ;;  %v506_v52 = vld [vmem:[#allocation7 + $0x10] sm:$0xff]   ;;  %v507_v53 = vld [vmem:[#allocation7 + $0x18] sm:$0xff]   ;;  %vm627_vm0 = vmmov 0   ;;  %s628_s19 = smov [#allocation8]  }
  0x3f   :  { %v89_v22 = vsub.s32 0, %v88_v21  ;;  %v93_v37 = vsub.s32 1, %v88_v21  ;;  %450 = vmatpush3.bf16.msra.mxu1 %v504_v49  ;;  %v508_v54 = vld [vmem:[#allocation7 + $0x20] sm:$0xff]   ;;  %465 = vmatprep.mubr.msk.bf16.mxu1 %vm627_vm0, %v626_v50  ;;  %v509_v55 = vld [vmem:[#allocation7 + $0x28] sm:$0xff]   ;;  %v510_v56 = vld [vmem:[#allocation7 + $0x30] sm:$0xff]   ;;  %s398_s20 = sshll.u32 %s628_s19, 4  ;;  %s399_s20 = int_to_ptr.vmem [resolvable:$true] %s398_s20 }
  0x40   :  { %451 = vmatprep.subr.bf16.mxu1 %v626_v50  ;;  %v511_v57 = vld [vmem:[#allocation7 + $0x38] sm:$0xff]   ;;  %v430_v18 = vld [vmem:[%s743_s3 + $0x1] ss:$0 sm:$0xff]  ;;  %p595_p11 = scmp.lt.s32.totalorder %s399_s20, %s399_s20 }
  0x41   :  { %182 = vmatpush1.bf16.msra.mxu0 %v488_v6  ;;  %v90_v24 = vrot.slane %v85_v23, %v89_v22  ;;  %v94_v38 = vrot.slane %v85_v23, %v93_v37  ;;  %v431_v23 = vld [vmem:[%s745_s5] ss:$0 sm:$0xff] }
  0x42   :  { %183 = vmatprep.subr.bf16.mxu0 %v489_v7 }
  0x43   :  { %452 = vmatpush3.bf16.msra.mxu1 %v505_v51 }
  0x44   :  { %453 = vmatprep.subr.bf16.mxu1 %v626_v50 }
  0x45   :  { %184 = vmatpush1.bf16.msra.mxu0 %v491_v8 }
  0x46   :  { %185 = vmatprep.subr.bf16.mxu0 %v492_v9 }
  0x47   :  { %454 = vmatpush3.bf16.msra.mxu1 %v506_v52 }
  0x48   :  { %455 = vmatprep.subr.bf16.mxu1 %v626_v50 }
  0x49   :  { %186 = vmatpush1.bf16.msra.mxu0 %v494_v10 }
  0x4a   :  { %187 = vmatprep.subr.bf16.mxu0 %v495_v11 }
  0x4b   :  { %456 = vmatpush3.bf16.msra.mxu1 %v507_v53 }
  0x4c   :  { %457 = vmatprep.subr.bf16.mxu1 %v626_v50 }
  0x4d   :  { %188 = vmatpush1.bf16.msra.mxu0 %v497_v12 }
  0x4e   :  { %189 = vmatprep.subr.bf16.mxu0 %v498_v13  ;;  %v429_v13 = vld [vmem:[%s743_s3] ss:$0 sm:$0xff]  ;;  %s590_s3 = scalar_lea.vmem %s399_s20, 256 }
  0x4f   :  { %458 = vmatpush3.bf16.msra.mxu1 %v508_v54  ;;  %p591_p10 = scmp.ne.s32.totalorder %s399_s20, %s590_s3  ;;  %p596_p12 = scmp.lt.s32.totalorder %s590_s3, %s590_s3 }
  0x50   :  { %459 = vmatprep.subr.bf16.mxu1 %v626_v50 }
  0x51   :  { %190 = vmatpush1.bf16.msra.mxu0 %v500_v14  ;;  %p597_p13 = por %p596_p12, %p595_p11 }
  0x52   :  { %191 = vmatprep.subr.bf16.mxu0 %v501_v15 }
  0x53   :  { %460 = vmatpush3.bf16.msra.mxu1 %v509_v55  ;;  %p598_p0 = pnand %p597_p13, %p591_p10 }
  0x54   :  { %461 = vmatprep.subr.bf16.mxu1 %v626_v50 }
  0x55   :  { %192 = vmatpush1.bf16.msra.mxu0 %v503_v16 }
  0x57   :  { %462 = vmatpush3.bf16.msra.mxu1 %v510_v56 }
  0x58   :  { %210 = vmatmul.mubr.bf16.vlgmr.msra.gmra.mrb[0].mxu0 %v68_v19  ;;  %463 = vmatprep.subr.bf16.mxu1 %v626_v50 }
  0x5b   :  { %464 = vmatpush3.bf16.msra.mxu1 %v511_v57 }
 0x12b   :  { %v211_v25 = vpop.f32.mrb[0].mxu0 }
 0x12c   :  { %v212_v26 = vadd.f32 %v211_v25, %v90_v24  ;;  %v213_v27 = vpop.f32.mrb[1].mxu0 }
 0x12d   :  { %v215_v28 = vpop.f32.mrb[2].mxu0  ;;  %v214_v41 = vadd.f32 %v213_v27, %v94_v38 }
 0x12e   :  { %v427_v29 = vmul.f32 -1.442695, %v212_v26  ;;  %v216_v30 = vadd.f32 %v215_v28, %v90_v24  ;;  %v217_v31 = vpop.f32.mrb[3].mxu0 }
 0x12f   :  { %v218_v45 = vadd.f32 %v217_v31, %v94_v38 }
 0x130   :  { %512 = vpow2.f32 %v427_v29  ;;  %v428_v32 = vmul.f32 -1.442695, %v216_v30 }
 0x132   :  { %514 = vpow2.f32 %v428_v32 }
 0x13a   :  { %v513_v33 = vpop.eup %512 }
 0x13b   :  { %v226_v34 = vadd.f32 1.0, %v513_v33 }
 0x13c   :  { %v515_v35 = vpop.eup %514 }
 0x13d   :  { %516 = vrcp.f32 %v226_v34  ;;  %v227_v36 = vadd.f32 1.0, %v515_v35 }
 0x13f   :  { %518 = vrcp.f32 %v227_v36 }
 0x147   :  { %v517_v39 = vpop.eup %516 }
 0x148   :  { %v232_v40 = vmul.f32 %v517_v39, %v212_v26 }
 0x149   :  { %v519_v42 = vpop.eup %518 }
 0x14a   :  { %v234_v43 = vmul.f32 %v232_v40, %v214_v41  ;;  %v233_v44 = vmul.f32 %v519_v42, %v216_v30 }
 0x14c   :  { %v235_v46 = vmul.f32 %v233_v44, %v218_v45  ;;  %236 = vadd.xlane.f32.xlu0 %v234_v43  ;;  %v242_v47 = vmul.f32 %v234_v43, %v234_v43 }
 0x14e   :  { %244 = vadd.xlane.f32.xlu1 %v242_v47  ;;  %v243_v48 = vmul.f32 %v235_v46, %v235_v46 }
 0x150   :  { %238 = vadd.xlane.f32.xlu0 %v235_v46 }
 0x152   :  { %246 = vadd.xlane.f32.xlu1 %v243_v48 }
 0x1d9   :  { %v237_v58 = vpop.xlane.xlu0 %236 }
 0x1da   :  { %v240_v59 = vmul.f32 0.015625, %v237_v58 }
 0x1db   :  { %v245_v60 = vpop.xlane.xlu1 %244 }
 0x1dc   :  { %v250_v61 = vmul.f32 %v240_v59, %v240_v59  ;;  %v248_v62 = vmul.f32 0.015625, %v245_v60  ;;  %v258_v10 = vsub.f32 %v234_v43, %v240_v59 }
 0x1dd   :  { %v239_v63 = vpop.xlane.xlu0 %238 }
 0x1de   :  { %v252_v0 = vsub.f32 %v248_v62, %v250_v61  ;;  %v241_v1 = vmul.f32 0.015625, %v239_v63 }
 0x1df   :  { %v247_v2 = vpop.xlane.xlu1 %246 }
 0x1e0   :  { %v254_v3 = vmax.f32 %v252_v0, 0.0  ;;  %v251_v4 = vmul.f32 %v241_v1, %v241_v1  ;;  %v249_v5 = vmul.f32 0.015625, %v247_v2  ;;  %v259_v14 = vsub.f32 %v235_v46, %v241_v1 }
 0x1e2   :  { %v260_v6 = vadd.f32 1e-05, %v254_v3  ;;  %v253_v7 = vsub.f32 %v249_v5, %v251_v4 }
 0x1e4   :  { %520 = vrsqrt.f32 %v260_v6  ;;  %v255_v8 = vmax.f32 %v253_v7, 0.0 }
 0x1e6   :  { %v261_v9 = vadd.f32 1e-05, %v255_v8 }
 0x1e8   :  { %522 = vrsqrt.f32 %v261_v9 }
 0x1ee   :  { %v521_v11 = vpop.eup %520 }
 0x1ef   :  { %v264_v12 = vmul.f32 %v521_v11, %v258_v10 }
 0x1f1   :  { %v270_v17 = vmul.f32 %v429_v13, %v264_v12 }
 0x1f2   :  { %v523_v15 = vpop.eup %522 }
 0x1f3   :  { %v265_v16 = vmul.f32 %v523_v15, %v259_v14  ;;  %v276_v20 = vadd.f32 %v430_v18, %v270_v17 }
 0x1f5   :  { %v271_v19 = vmul.f32 %v429_v13, %v265_v16 }
 0x1f7   :  { %v277_v21 = vadd.f32 %v430_v18, %v271_v19 }
 0x1f9   :  { %v278_v22 = vpack.c.bf16 %v277_v21, %v276_v20 }
 0x1fb   :  { %466 = vmatmul.mubr.bf16.vlgmr.msra.gmra.mrb[0].mxu1 %v278_v22 }
 0x2ce   :  { %v384_v24 = vpop.f32.mrb[0].mxu1 }
 0x2cf   :  { %v385_v25 = vadd.f32 %v431_v23, %v384_v24  ;;  %v467_v26 = vpop.f32.mrb[1].mxu1 }
 0x2d0   :  { %v387_v27 = vpop.f32.mrb[2].mxu1 }
 0x2d1   :  { %391 = vst [vmem:[#allocation8] sm:$0xff] %v385_v25  ;;  %v388_v28 = vadd.f32 %v431_v23, %v387_v27  ;;  %v468_v29 = vpop.f32.mrb[3].mxu1 }
 0x2d3   :  { %392 = vst [vmem:[#allocation8 + $0x8] sm:$0xff] %v388_v28 }
 0x2d4   :  { %601 = shalt.err (!%p598_p0)
}
 0x2d5   :  { %s602_s21 = scalar_lea.hbm %s746_s6, 256 }
 0x2d6   :  { %p603_p1 = scmp.ne.s32.totalorder %s746_s6, %s602_s21  ;;  %p606_p2 = scmp.lt.u32.totalorder %s602_s21, %s746_s6 }
 0x2d8   :  { %p608_p3 = pnand %p606_p2, %p603_p1 }
 0x2da   :  { %611 = shalt.err (!%p608_p3)
}
 0x2db   :  { %404 = dma.vmem_to_hbm [thread:$0]  %s399_s20, 256, %s746_s6, [#allocation4], %s620_s9, %s620_s9, %s621_s10  }
 0x2dc   :  { %616 = dma.done.wait [#allocation4], 256  }
 0x2dd   :  { %617 = vsyncadd [#allocation4], 4294967040 }
 0x2de   :  { %408 = vsyncpa [#allocation3], 1 }
 0x2df   :  { %409 = vsyncpa [#allocation6], 1 }
 0x2e0   :  { %410 = vsyncpa [#allocation4], 1 }

</bundles_post_ra>
